<compile_context>
chip_gen: v7x
topology: tpu7x:2x2x1
jax: 0.10.0
libtpu: 0.0.40
codegen_flags: <defaults>
</compile_context>

<pallas_src>
import jax
import jax.numpy as jnp
from jax import lax
from jax.experimental import pallas as pl
from jax.experimental.pallas import tpu as pltpu


def _pos_embed_kernel(tbl_ref, out_ref):
    """Writes one (TB, 8, 8*E) lane-dense output tile.

    tbl_ref: (8, 8*E)      combined table: tbl[r, f*E:(f+1)*E] = rank[r]+file[f]
    out_ref: (TB, 8, 8*E)  flattened view of (TB, 64, E)
    """
    tb = out_ref.shape[0]
    tbl = tbl_ref[...]                              # (8, 8*E): 2 vregs at E=32
    # Chunked store loop: the invariant table stays resident in a few vregs
    # (no TB-wide broadcast materialization / vreg spill); loop overhead is
    # amortized over 8-row chunks and hidden under the writeback DMA.
    chunk = 8 if tb % 8 == 0 else 1
    rep = jnp.broadcast_to(tbl[None, :, :], (chunk,) + tbl.shape)

    def body(i, carry):
        start = pl.multiple_of(i * chunk, chunk)
        out_ref[pl.ds(start, chunk)] = rep
        return carry

    lax.fori_loop(0, tb // chunk, body, 0)


def positional_embedding(rank_embed: jax.Array,
                         file_embed: jax.Array,
                         batch_size: int,
                         *,
                         target_tile_bytes: int = 4 << 20) -> jax.Array:
    """Pallas equivalent of PositionalEmbedding.forward(batch_size)."""
    assert rank_embed.shape == file_embed.shape
    assert rank_embed.shape[0] == 8
    embed_dim = rank_embed.shape[1]
    dtype = rank_embed.dtype
    itemsize = jnp.dtype(dtype).itemsize

    # Precompute the lane-dense (8, 8*E) table in the wrapper (tiny XLA op):
    # row r = [rank[r]+file[0] | rank[r]+file[1] | ... | rank[r]+file[7]].
    tbl = (rank_embed[:, None, :] + file_embed[None, :, :]).reshape(8, 8 * embed_dim)

    # Batch-block so each output tile is a big contiguous writeback (~4 MiB),
    # but keep >= 2 grid steps so both v7x TensorCores get work.
    row_bytes = 64 * embed_dim * itemsize
    tb = min(batch_size, target_tile_bytes // row_bytes, pl.cdiv(batch_size, 2))
    tb = int(max(1, tb))
    grid = (pl.cdiv(batch_size, tb),)

    flat = pl.pallas_call(
        _pos_embed_kernel,
        out_shape=jax.ShapeDtypeStruct((batch_size, 8, 8 * embed_dim), dtype),
        grid=grid,
        in_specs=[
            # Constant index_map -> table fetched into VMEM once, reused.
            pl.BlockSpec((8, 8 * embed_dim), lambda b: (0, 0)),
        ],
        out_specs=pl.BlockSpec((tb, 8, 8 * embed_dim), lambda b: (b, 0, 0)),
        compiler_params=pltpu.CompilerParams(
            dimension_semantics=("parallel",)),   # shards batch tiles across v7x cores
        cost_estimate=pl.CostEstimate(
            flops=0,
            transcendentals=0,
            bytes_accessed=batch_size * 64 * embed_dim * itemsize
            + 8 * 8 * embed_dim * itemsize),
    )(tbl)

    # (B, 8, 8*E) is row-major identical to (B, 64, E): p = 8*r + f.
    return flat.reshape(batch_size, 64, embed_dim)


def positional_embedding_ref(rank_embed, file_embed, batch_size):
    """Pure-JAX reference mirroring the PyTorch forward exactly."""
    positions = jnp.broadcast_to(jnp.arange(64)[None, :], (batch_size, 64))
    ranks = positions // 8
    files = positions % 8
    return rank_embed[ranks] + file_embed[files]               # (B, 64, E)


if __name__ == "__main__":
    embed_dim = 32
    batch_size = 2

    # Deterministic "learned" parameters (nn.Embedding(8, embed_dim).weight
    # is N(0,1) initialized in PyTorch; we init deterministically here).
    key = jax.random.PRNGKey(0)
    k_rank, k_file = jax.random.split(key)
    rank_embed = jax.random.normal(k_rank, (8, embed_dim), dtype=jnp.float32)
    file_embed = jax.random.normal(k_file, (8, embed_dim), dtype=jnp.float32)

    out = positional_embedding(rank_embed, file_embed, batch_size)
    out = jax.block_until_ready(out)

    ref = positional_embedding_ref(rank_embed, file_embed, batch_size)
    assert out.shape == (batch_size, 64, embed_dim)
    assert out.dtype == jnp.float32
    assert jnp.allclose(out, ref, atol=1e-6, rtol=1e-6)

    print("KERNEL_OK")
</pallas_src>

<mosaic_0001>
module attributes {stable_mosaic.version = 11 : i64} {
  func.func @_pos_embed_kernel(%arg0: i32, %arg1: memref<8x256xf32, #tpu.memory_space<vmem>>, %arg2: memref<1x8x256xf32, #tpu.memory_space<vmem>>) attributes {dimension_semantics = [#tpu.dimension_semantics<parallel>], iteration_bounds = array<i64: 2>, scalar_prefetch = 0 : i64, scratch_operands = 0 : i64, tpu.core_type = #tpu.core_type<tc>, window_params = [{pipeline_mode = #tpu.pipeline_mode<synchronous>, transform_indices = @transform_0, window_bounds = array<i64: 8, 256>}, {transform_indices = @transform_1, window_bounds = array<i64: 1, 8, 256>}]} {
    %c0 = arith.constant 0 : index
    %c0_0 = arith.constant 0 : index
    %0 = vector.load %arg1[%c0, %c0_0] : memref<8x256xf32, #tpu.memory_space<vmem>>, vector<8x256xf32>
    %1 = vector.shape_cast %0 : vector<8x256xf32> to vector<1x8x256xf32>
    %c0_i32 = arith.constant 0 : i32
    %c1_i32 = arith.constant 1 : i32
    %2 = arith.muli %c0_i32, %c1_i32 : i32
    %3 = tpu.assume_multiple %2, 1 : i32
    %4 = arith.index_cast %3 : i32 to index
    %c0_1 = arith.constant 0 : index
    %c0_2 = arith.constant 0 : index
    %5 = vector.load %arg2[%4, %c0_1, %c0_2] : memref<1x8x256xf32, #tpu.memory_space<vmem>>, vector<1x8x256xf32>
    tpu.vector_store %arg2[%4, %c0_1, %c0_2], %1 {strides = array<i32>} : memref<1x8x256xf32, #tpu.memory_space<vmem>>, vector<1x8x256xf32>,
    %c1_i32_3 = arith.constant 1 : i32
    return
  }
  func.func @transform_0(%arg0: i32) -> (i32, i32) {
    %c0_i32 = arith.constant 0 : i32
    %c0_i32_0 = arith.constant 0 : i32
    %c0_i32_1 = arith.constant 0 : i32
    return %c0_i32, %c0_i32_0 : i32, i32
  }
  func.func @transform_1(%arg0: i32) -> (i32, i32, i32) {
    %c0_i32 = arith.constant 0 : i32
    %c0_i32_0 = arith.constant 0 : i32
    %c0_i32_1 = arith.constant 0 : i32
    return %arg0, %c0_i32, %c0_i32_0 : i32, i32, i32
  }
}

</mosaic_0001>

<bundles_post_ra>
// kernel: tpu_custom_call.1
= control target key start
LH: loop header
LB: loop body
LE: loop exit
PB: predicated region body
PF: predicated region fallthrough
CT: control target
= control target key end

     0   :  { %6 = vsyncpa [#allocation3], 0  ;;  %s489_s0 = inlined_call_operand.hbm [shape: f32[8,256], index: 0, kind: input, shape index: {}]   ;;  %s490_s1 = inlined_call_operand.hbm [shape: f32[2,8,256], index: 1, kind: output, shape index: {}]  }
   0x1   :  { %7 = vsyncpa [#allocation4], 0 }
   0x2   :  { %9 = vsyncpa [#allocation4 + $0x1], 0  ;;  %s359_s6 = smov 0   ;;  %s361_s7 = smov 0  }
   0x3   :  { %s363_s8 = smov 0   ;;  %s365_s9 = smov 0  }
   0x4 LB: > { %s380_s10 = sadd.s32 4294967295, %s345_s9   ;;  %s189_s11 = sadd.s32 4294967294, %s345_s9   ;;  %s345_s9 = sphi %s365_s9, %s506_s9   ;;  %s341_s8 = sphi %s363_s8, %s505_s8   ;;  %s337_s7 = sphi %s361_s7, %s504_s7   ;;  %s333_s6 = sphi %s359_s6, %s503_s6  }
   0x5   : > { %s384_s12 = sadd.s32 1, %s345_s9   ;;  %s43_s13 = sadd.s32 1, %s341_s8 }
   0x6   : > { %s40_s14 = ssub.s32 %s345_s9, %s384_s12  ;;  %p53_p0 = scmp.ne.s32.totalorder %s341_s8, %s337_s7 }
   0x7   : > { %p41_p1 = scmp.eq.s32.totalorder %s40_s14, 0  ;;  %p54_p2 = scmp.eq.s32.totalorder %s380_s10, 1 }
   0x8   : > { %p59_p3 = scmp.ne.s32.totalorder %s337_s7, %s333_s6  ;;  %p60_p4 = scmp.eq.s32.totalorder %s189_s11, 1 }
   0x9   : > { %s395_s15 = scalar_select %p41_p1, %s341_s8, %s43_s13  }
   0xa   : > { %p397_p5 = por %p54_p2, %p53_p0  ;;  %p401_p6 = por %p60_p4, %p59_p3 }
   0xb   : > { %p190_p7 = scmp.ge.s32.totalorder %s345_s9, 1  ;;  %p67_p8 = scmp.lt.s32.totalorder %s345_s9, 3 }
   0xc   : > { %s494_s16 = scalar_select %p397_p5, 1, 0 }
   0xd   : > { %s495_s17 = scalar_select %p401_p6, 1, 0 }
   0xe   : > { %p491_p9 = scmp.eq.s32.totalorder %s380_s10, 0  ;;  %p408_p10 = pnand %p190_p7, %p67_p8 }
   0xf   : > { %s347_s19 = smov [#allocation2]   ;;  %s251_s24 = scalar_lea.hbm %s489_s0, 256 }
  0x10   : > { %s496_s18 = scalar_select %p408_p10, 1, 0 }
  0x11   : > { %s80_s20 = sshll.u32 %s347_s19, 4  ;;  %p207_p11 = pneg %p408_p10  ;;  %s81_s20 = int_to_ptr.vmem [resolvable:$true] %s80_s20 }
  0x12   : > { %p252_p13 = scmp.ne.s32.totalorder %s489_s0, %s251_s24  ;;  %p258_p3 = scmp.lt.u32.totalorder %s251_s24, %s489_s0 }
  0x13   : > { %p416_p12 = pnand %p491_p9, %p207_p11 }
  0x15   : > { %p253_p0 = pneg %p416_p12 }
  0x17   : > { %p254_p1 = pnand %p253_p0, %p252_p13 }
  0x19   : > { %p255_p2 = pneg %p254_p1 }
  0x1b   : > { %p260_p4 = pnand %p258_p3, %p255_p2 }
  0x1d   : > { %263 = shalt.err (!%p260_p4)
}
  0x1e   : > { %s264_s29 = scalar_lea.vmem %s81_s20, 256  ;;  %p272_p9 = scmp.lt.s32.totalorder %s81_s20, %s81_s20 }
  0x1f   : > { %p265_p7 = scmp.ne.s32.totalorder %s81_s20, %s264_s29  ;;  %p273_p6 = scmp.lt.s32.totalorder %s264_s29, %s264_s29 }
  0x21   : > { %p267_p8 = pnand %p265_p7, %p253_p0  ;;  %p274_p5 = por %p273_p6, %p272_p9 }
  0x23   : > { %p268_p11 = pneg %p267_p8 }
  0x25   : > { %p275_p10 = pnand %p274_p5, %p268_p11 }
  0x27   : > { %278 = shalt.err (!%p275_p10)
}
  0x28   : > { %210 = dma.hbm_to_vmem [thread:$0]  (!%p416_p12), %s489_s0, 256, %s81_s20, [#allocation3]  }
  0x29   : > { %p498_p13 = scmp.ne.s32.totalorder %s496_s18, 0 }
  0x2a   : > { %p499_p1 = scmp.eq.s32.totalorder (!%p498_p13), %s380_s10, 0 }
  0x2b   : > { %93 = sbr.rel (%p498_p13) target bundleno = 77 (0x4d), region = 24 }
  0x32   : > { %324 = dma.done.wait (%p499_p1), [#allocation3], 256   ;;  %p500_p0 = pmov %p499_p1 }
  0x33   : > { %s105_s3 = sand.u32 1, %s337_s7   ;;  %s200_s13 = sshll.u32 %s380_s10, 8  ;;  %v108_v0 = vld [vmem:[#allocation2] sm:$0xff]  ;;  %v109_v1 = vld [vmem:[#allocation2 + $0x8] sm:$0xff] }
  0x34   : > { %326 = vsyncadd (%p500_p0), [#allocation3], 4294967040  ;;  %s194_s4 = sshll.u32 %s105_s3, 4  ;;  %s449_s18 = scalar_lea.hbm %s490_s1, %s200_s13 }
  0x35   : > { %s107_s5 = scalar_lea.vmem [#allocation5], %s194_s4  ;;  %s116_s20 = scalar_lea.sflag [#allocation4], %s105_s3 }
  0x36   : > { %s130_s11 = sshll.u32 %s107_s5, 4  ;;  %113 = vst [vmem:[%s107_s5] sm:$0xff] %v108_v0  ;;  %114 = vst [vmem:[%s107_s5 + $0x8] sm:$0xff] %v109_v1  ;;  %p501_p6 = scmp.ne.s32.totalorder %s494_s16, 0  ;;  %s444_s11 = int_to_ptr.vmem [resolvable:$true] %s130_s11 }
  0x37   : > { %s279_s21 = scalar_lea.vmem %s444_s11, 256  ;;  %s348_s10 = smov [#allocation5]  }
  0x38   : > { %p280_p5 = scmp.ne.s32.totalorder %s444_s11, %s279_s21  ;;  %s283_s22 = sshll.u32 %s348_s10, 4  ;;  %s284_s22 = int_to_ptr.vmem [resolvable:$false] %s283_s22 }
  0x39   : > { %s285_s23 = scalar_lea.vmem %s284_s22, 512  ;;  %p286_p12 = scmp.lt.s32.totalorder %s444_s11, %s284_s22 }
  0x3a   : > { %p281_p9 = pnand %p280_p5, %p501_p6  ;;  %p287_p2 = scmp.lt.s32.totalorder %s285_s23, %s279_s21 }
  0x3c   : > { %p282_p10 = pneg %p281_p9  ;;  %p288_p3 = por %p287_p2, %p286_p12 }
  0x3e   : > { %p289_p4 = pnand %p288_p3, %p282_p10 }
  0x40   : > { %292 = shalt.err (!%p289_p4)
}
  0x41   : > { %s293_s24 = scalar_lea.hbm %s449_s18, 256  ;;  %s297_s27 = scalar_lea.hbm %s490_s1, 512 }
  0x42   : > { %p294_p7 = scmp.ne.s32.totalorder %s449_s18, %s293_s24  ;;  %p298_p13 = scmp.lt.u32.totalorder %s449_s18, %s490_s1 }
  0x43   : > { %p299_p1 = scmp.lt.u32.totalorder %s297_s27, %s293_s24  ;;  %p301_p5 = scmp.lt.u32.totalorder %s293_s24, %s449_s18 }
  0x44   : > { %p295_p8 = pnand %p294_p7, %p501_p6 }
  0x45   : > { %p300_p0 = por %p299_p1, %p298_p13 }
  0x46   : > { %p296_p11 = pneg %p295_p8 }
  0x47   : > { %p302_p9 = por %p301_p5, %p300_p0 }
  0x49   : > { %p303_p10 = pnand %p302_p9, %p296_p11 }
  0x4b   : > { %306 = shalt.err (!%p303_p10)
}
  0x4c   : > { %205 = dma.vmem_to_hbm [thread:$0]  (%p501_p6), %s444_s11, 256, %s449_s18, %s116_s20  }
  0x4d PF: > { %p217_p12 = scmp.ge.s32.totalorder %s345_s9, 2  ;;  %s142_s30 = sand.u32 1, %s333_s6  }
  0x4e   : > { %p502_p2 = scmp.ne.s32.totalorder %s495_s17, 0  ;;  %s143_s2 = scalar_lea.sflag [#allocation4], %s142_s30 }
  0x50   : > { %p212_p3 = pnand %p217_p12, %p502_p2 }
  0x52   : > { %328 = dma.done.wait (!%p212_p3), %s143_s2, 256  }
  0x53   : > { %330 = vsyncadd (!%p212_p3), %s143_s2, 4294967040  ;;  %p12_p4 = scmp.ge.s32.totalorder %s384_s12, 4   ;;  %s503_s6 = smov %s337_s7 }
  0x54   : > { %s504_s7 = smov %s341_s8  ;;  %s505_s8 = smov %s395_s15 }
  0x55   : > { %s506_s9 = smov %s384_s12  ;;  %14 = sbr.rel (!%p12_p4) target bundleno = 4 (0x4), region = 62 }
  0x5c   :  { %148 = vsyncpa [#allocation3], 1 }
  0x5d   :  { %150 = vsyncpa [#allocation3 + $0x1], 1 }
  0x5e   :  { %151 = vsyncpa [#allocation4], 1 }
  0x5f   :  { %153 = vsyncpa [#allocation4 + $0x1], 1 }

</bundles_post_ra>
